<compile_context>
chip_gen: v7x
topology: tpu7x:2x2x1
jax: 0.10.0
libtpu: 0.0.40
codegen_flags: <defaults>
</compile_context>

<pallas_src>
import functools

import jax
import jax.numpy as jnp
from jax.experimental import pallas as pl
from jax.experimental.pallas import tpu as pltpu


def _conv_bn_lrelu_kernel(x_ref, w_ref, shift_ref, o_ref, p_ref, *,
                          nb, H, W, cin_p, slope):
  """Fused 3x3 conv + folded-BN + LeakyReLU for `nb` images per grid step.

  x_ref:     (nb, 3, cin_p, (H+2)*W)  column-shifted, row-flattened padded
                                      input planes (bf16): plane kw holds
                                      x_pad[:, :, :, kw:kw+W] flattened over
                                      (H+2, W).
  w_ref:     (cout, 9*cin_p)          BN-scale-folded weights, contraction
                                      axis ordered (kh, kw, cin), bf16.
  shift_ref: (cout, 1)                beta - running_mean * scale (f32).
  o_ref:     (nb, cout, H*W)          output, channel-major (lane-dense).
  p_ref:     (9*cin_p, nb*H*W)        bf16 VMEM scratch for the im2col patch.
  """
  HW = H * W
  # Build the im2col patch in VMEM.  Row block t = kh*3 + kw holds, for every
  # output pixel m = h*W + w, the value x_pad[c, h+kh, w+kw].  The column
  # shift (kw) was pre-applied in the wrapper, so each tap is a contiguous
  # lane slice at offset kh*W of the flattened plane; with cin_p a multiple
  # of 16 every bf16 scratch write is sublane-tile aligned.
  for i in range(nb):
    for kw in range(3):
      plane = x_ref[i, kw]                                  # (cin_p, (H+2)*W)
      for kh in range(3):
        t = kh * 3 + kw
        p_ref[t * cin_p:(t + 1) * cin_p, i * HW:(i + 1) * HW] = (
            plane[:, kh * W: kh * W + HW])

  # Single MXU pass: (cout, 9*cin_p) @ (9*cin_p, nb*H*W) -> lane-dense acc.
  acc = jnp.dot(w_ref[...], p_ref[...],
                preferred_element_type=jnp.float32)         # (cout, nb*HW)

  # Folded BatchNorm shift + LeakyReLU(slope), in f32.
  y = acc + shift_ref[...]
  y = jnp.where(y > 0, y, slope * y).astype(o_ref.dtype)
  for i in range(nb):
    o_ref[i] = y[:, i * HW:(i + 1) * HW]


def conv_block_forward(x_nchw, w_oihw, gamma, beta, mean, var, *,
                       eps=1e-5, slope=0.1, images_per_step=1):
  """ConvBlock forward pass.  NCHW in, NCHW out (matches the PyTorch module)."""
  N, Cin, H, W = x_nchw.shape
  Cout = w_oihw.shape[0]
  assert w_oihw.shape == (Cout, Cin, 3, 3)
  assert N % images_per_step == 0
  nb = images_per_step
  HW = H * W

  # Pad Cin up to a multiple of 16: bf16 packs 16 rows per sublane tile, so
  # the im2col scratch writes (row offsets t*cin_p) stay tile aligned.  Zero
  # channels are free on the MXU (K is padded internally anyway).
  cin_p = ((Cin + 15) // 16) * 16

  # ---- fold BN (inference) into the conv weights ---------------------------
  scale = gamma / jnp.sqrt(var + eps)                               # (Cout,)
  shift = (beta - mean * scale).reshape(Cout, 1).astype(jnp.float32)
  w_f = w_oihw.astype(jnp.float32) * scale[:, None, None, None]
  w_f = jnp.pad(w_f, ((0, 0), (0, cin_p - Cin), (0, 0), (0, 0)))
  # (Cout, Cin_p, kh, kw) -> (Cout, kh, kw, Cin_p) -> (Cout, 9*Cin_p), bf16.
  w_k = jnp.transpose(w_f, (0, 2, 3, 1)).reshape(Cout, 9 * cin_p)
  w_k = w_k.astype(jnp.bfloat16)

  # ---- column-shifted, row-flattened padded input (bf16 transport) ---------
  # x_cols[n, kw, c, r*W + w] = x_pad[n, c, r, w + kw],  r in [0, H+2).
  x_pad = jnp.pad(x_nchw, ((0, 0), (0, cin_p - Cin), (1, 1), (1, 1)))
  x_cols = jnp.stack([x_pad[:, :, :, kw:kw + W] for kw in range(3)], axis=1)
  x_cols = x_cols.reshape(N, 3, cin_p, (H + 2) * W).astype(jnp.bfloat16)

  kernel = functools.partial(_conv_bn_lrelu_kernel, nb=nb, H=H, W=W,
                             cin_p=cin_p, slope=slope)
  out = pl.pallas_call(
      kernel,
      out_shape=jax.ShapeDtypeStruct((N, Cout, HW), x_nchw.dtype),
      grid_spec=pltpu.PrefetchScalarGridSpec(
          num_scalar_prefetch=0,
          grid=(N // nb,),
          in_specs=[
              pl.BlockSpec((nb, 3, cin_p, (H + 2) * W),
                           lambda n: (n, 0, 0, 0)),
              pl.BlockSpec((Cout, 9 * cin_p), lambda n: (0, 0)),
              pl.BlockSpec((Cout, 1), lambda n: (0, 0)),
          ],
          out_specs=pl.BlockSpec((nb, Cout, HW), lambda n: (n, 0, 0)),
          scratch_shapes=[pltpu.VMEM((9 * cin_p, nb * HW), jnp.bfloat16)],
      ),
      compiler_params=pltpu.CompilerParams(
          dimension_semantics=("parallel",)),
  )(x_cols, w_k, shift)

  # Channel-major kernel output is already NCHW: just split H*W.  No transpose.
  return out.reshape(N, Cout, H, W)


def _reference(x, w, gamma, beta, mean, var, eps=1e-5, slope=0.1):
  """Pure-JAX reference (XLA conv) for a tolerance check."""
  y = jax.lax.conv_general_dilated(
      x, w, window_strides=(1, 1), padding=((1, 1), (1, 1)),
      dimension_numbers=("NCHW", "OIHW", "NCHW"))
  s = gamma / jnp.sqrt(var + eps)
  y = y * s[None, :, None, None] + (beta - mean * s)[None, :, None, None]
  return jnp.where(y > 0, y, slope * y)


if __name__ == "__main__":
  key = jax.random.PRNGKey(0)
  kx, kw, kg, kb, km, kv = jax.random.split(key, 6)

  N, Cin, H, W = 2, 4, 16, 16
  Cout = 8

  x = jax.random.normal(kx, (N, Cin, H, W), jnp.float32)
  w = 0.1 * jax.random.normal(kw, (Cout, Cin, 3, 3), jnp.float32)
  gamma = 1.0 + 0.1 * jax.random.normal(kg, (Cout,), jnp.float32)
  beta = 0.1 * jax.random.normal(kb, (Cout,), jnp.float32)
  mean = 0.1 * jax.random.normal(km, (Cout,), jnp.float32)
  var = jnp.abs(jax.random.normal(kv, (Cout,), jnp.float32)) + 0.5

  out = jax.jit(conv_block_forward)(x, w, gamma, beta, mean, var)
  out = jax.block_until_ready(out)
  assert out.shape == (N, Cout, H, W), out.shape
  assert bool(jnp.all(jnp.isfinite(out)))

  ref = _reference(x, w, gamma, beta, mean, var)
  err = float(jnp.max(jnp.abs(out - ref)))
  assert err < 5e-2, f"max abs error {err}"   # bf16-operand tolerance

  print("KERNEL_OK")
</pallas_src>

<mosaic_0001>
module attributes {stable_mosaic.version = 11 : i64} {
  func.func @_conv_bn_lrelu_kernel(%arg0: i32, %arg1: memref<1x3x16x288xbf16, #tpu.memory_space<vmem>>, %arg2: memref<8x144xbf16, #tpu.memory_space<vmem>>, %arg3: memref<8x1xf32, #tpu.memory_space<vmem>>, %arg4: memref<1x8x256xf32, #tpu.memory_space<vmem>>, %arg5: memref<144x256xbf16, #tpu.memory_space<vmem>>) attributes {dimension_semantics = [#tpu.dimension_semantics<parallel>], iteration_bounds = array<i64: 2>, scalar_prefetch = 0 : i64, scratch_operands = 1 : i64, tpu.core_type = #tpu.core_type<tc>, window_params = [{transform_indices = @transform_0, window_bounds = array<i64: 1, 3, 16, 288>}, {pipeline_mode = #tpu.pipeline_mode<synchronous>, transform_indices = @transform_1, window_bounds = array<i64: 8, 144>}, {pipeline_mode = #tpu.pipeline_mode<synchronous>, transform_indices = @transform_2, window_bounds = array<i64: 8, 1>}, {transform_indices = @transform_3, window_bounds = array<i64: 1, 8, 256>}]} {
    %c0 = arith.constant 0 : index
    %c0_0 = arith.constant 0 : index
    %c0_1 = arith.constant 0 : index
    %c0_2 = arith.constant 0 : index
    %0 = vector.load %arg1[%c0, %c0_0, %c0_1, %c0_2] : memref<1x3x16x288xbf16, #tpu.memory_space<vmem>>, vector<1x1x16x288xbf16>
    %1 = vector.shape_cast %0 : vector<1x1x16x288xbf16> to vector<16x288xbf16>
    %2 = vector.extract_strided_slice %1 {offsets = [0, 0], sizes = [16, 256], strides = [1, 1]} : vector<16x288xbf16> to vector<16x256xbf16>
    %c0_3 = arith.constant 0 : index
    %c0_4 = arith.constant 0 : index
    %3 = vector.load %arg5[%c0_3, %c0_4] : memref<144x256xbf16, #tpu.memory_space<vmem>>, vector<16x256xbf16>
    tpu.vector_store %arg5[%c0_3, %c0_4], %2 {strides = array<i32>} : memref<144x256xbf16, #tpu.memory_space<vmem>>, vector<16x256xbf16>,
    %4 = vector.extract_strided_slice %1 {offsets = [0, 16], sizes = [16, 256], strides = [1, 1]} : vector<16x288xbf16> to vector<16x256xbf16>
    %c48 = arith.constant 48 : index
    %c0_5 = arith.constant 0 : index
    %5 = vector.load %arg5[%c48, %c0_5] : memref<144x256xbf16, #tpu.memory_space<vmem>>, vector<16x256xbf16>
    tpu.vector_store %arg5[%c48, %c0_5], %4 {strides = array<i32>} : memref<144x256xbf16, #tpu.memory_space<vmem>>, vector<16x256xbf16>,
    %6 = vector.extract_strided_slice %1 {offsets = [0, 32], sizes = [16, 256], strides = [1, 1]} : vector<16x288xbf16> to vector<16x256xbf16>
    %c96 = arith.constant 96 : index
    %c0_6 = arith.constant 0 : index
    %7 = vector.load %arg5[%c96, %c0_6] : memref<144x256xbf16, #tpu.memory_space<vmem>>, vector<16x256xbf16>
    tpu.vector_store %arg5[%c96, %c0_6], %6 {strides = array<i32>} : memref<144x256xbf16, #tpu.memory_space<vmem>>, vector<16x256xbf16>,
    %c0_7 = arith.constant 0 : index
    %c1 = arith.constant 1 : index
    %c0_8 = arith.constant 0 : index
    %c0_9 = arith.constant 0 : index
    %8 = vector.load %arg1[%c0_7, %c1, %c0_8, %c0_9] : memref<1x3x16x288xbf16, #tpu.memory_space<vmem>>, vector<1x1x16x288xbf16>
    %9 = vector.shape_cast %8 : vector<1x1x16x288xbf16> to vector<16x288xbf16>
    %10 = vector.extract_strided_slice %9 {offsets = [0, 0], sizes = [16, 256], strides = [1, 1]} : vector<16x288xbf16> to vector<16x256xbf16>
    %c16 = arith.constant 16 : index
    %c0_10 = arith.constant 0 : index
    %11 = vector.load %arg5[%c16, %c0_10] : memref<144x256xbf16, #tpu.memory_space<vmem>>, vector<16x256xbf16>
    tpu.vector_store %arg5[%c16, %c0_10], %10 {strides = array<i32>} : memref<144x256xbf16, #tpu.memory_space<vmem>>, vector<16x256xbf16>,
    %12 = vector.extract_strided_slice %9 {offsets = [0, 16], sizes = [16, 256], strides = [1, 1]} : vector<16x288xbf16> to vector<16x256xbf16>
    %c64 = arith.constant 64 : index
    %c0_11 = arith.constant 0 : index
    %13 = vector.load %arg5[%c64, %c0_11] : memref<144x256xbf16, #tpu.memory_space<vmem>>, vector<16x256xbf16>
    tpu.vector_store %arg5[%c64, %c0_11], %12 {strides = array<i32>} : memref<144x256xbf16, #tpu.memory_space<vmem>>, vector<16x256xbf16>,
    %14 = vector.extract_strided_slice %9 {offsets = [0, 32], sizes = [16, 256], strides = [1, 1]} : vector<16x288xbf16> to vector<16x256xbf16>
    %c112 = arith.constant 112 : index
    %c0_12 = arith.constant 0 : index
    %15 = vector.load %arg5[%c112, %c0_12] : memref<144x256xbf16, #tpu.memory_space<vmem>>, vector<16x256xbf16>
    tpu.vector_store %arg5[%c112, %c0_12], %14 {strides = array<i32>} : memref<144x256xbf16, #tpu.memory_space<vmem>>, vector<16x256xbf16>,
    %c0_13 = arith.constant 0 : index
    %c2 = arith.constant 2 : index
    %c0_14 = arith.constant 0 : index
    %c0_15 = arith.constant 0 : index
    %16 = vector.load %arg1[%c0_13, %c2, %c0_14, %c0_15] : memref<1x3x16x288xbf16, #tpu.memory_space<vmem>>, vector<1x1x16x288xbf16>
    %17 = vector.shape_cast %16 : vector<1x1x16x288xbf16> to vector<16x288xbf16>
    %18 = vector.extract_strided_slice %17 {offsets = [0, 0], sizes = [16, 256], strides = [1, 1]} : vector<16x288xbf16> to vector<16x256xbf16>
    %c32 = arith.constant 32 : index
    %c0_16 = arith.constant 0 : index
    %19 = vector.load %arg5[%c32, %c0_16] : memref<144x256xbf16, #tpu.memory_space<vmem>>, vector<16x256xbf16>
    tpu.vector_store %arg5[%c32, %c0_16], %18 {strides = array<i32>} : memref<144x256xbf16, #tpu.memory_space<vmem>>, vector<16x256xbf16>,
    %20 = vector.extract_strided_slice %17 {offsets = [0, 16], sizes = [16, 256], strides = [1, 1]} : vector<16x288xbf16> to vector<16x256xbf16>
    %c80 = arith.constant 80 : index
    %c0_17 = arith.constant 0 : index
    %21 = vector.load %arg5[%c80, %c0_17] : memref<144x256xbf16, #tpu.memory_space<vmem>>, vector<16x256xbf16>
    tpu.vector_store %arg5[%c80, %c0_17], %20 {strides = array<i32>} : memref<144x256xbf16, #tpu.memory_space<vmem>>, vector<16x256xbf16>,
    %22 = vector.extract_strided_slice %17 {offsets = [0, 32], sizes = [16, 256], strides = [1, 1]} : vector<16x288xbf16> to vector<16x256xbf16>
    %c128 = arith.constant 128 : index
    %c0_18 = arith.constant 0 : index
    %23 = vector.load %arg5[%c128, %c0_18] : memref<144x256xbf16, #tpu.memory_space<vmem>>, vector<16x256xbf16>
    tpu.vector_store %arg5[%c128, %c0_18], %22 {strides = array<i32>} : memref<144x256xbf16, #tpu.memory_space<vmem>>, vector<16x256xbf16>,
    %c0_19 = arith.constant 0 : index
    %c0_20 = arith.constant 0 : index
    %24 = vector.load %arg2[%c0_19, %c0_20] : memref<8x144xbf16, #tpu.memory_space<vmem>>, vector<8x144xbf16>
    %c0_21 = arith.constant 0 : index
    %c0_22 = arith.constant 0 : index
    %25 = vector.load %arg5[%c0_21, %c0_22] : memref<144x256xbf16, #tpu.memory_space<vmem>>, vector<144x256xbf16>
    %cst = arith.constant dense<0.000000e+00> : vector<8x256xf32>
    %26 = tpu.matmul %24, %25, %cst {dimension_numbers = #tpu.dot_dimension_numbers<[1], [0], [0], [1], [0, 0, 1, 1], [], []>} : vector<8x144xbf16>, vector<144x256xbf16>, vector<8x256xf32> -> vector<8x256xf32>
    %c0_23 = arith.constant 0 : index
    %c0_24 = arith.constant 0 : index
    %27 = vector.load %arg3[%c0_23, %c0_24] : memref<8x1xf32, #tpu.memory_space<vmem>>, vector<8x1xf32>
    %28 = vector.broadcast %27 : vector<8x1xf32> to vector<8x256xf32>
    %29 = arith.addf %26, %28 : vector<8x256xf32>
    %cst_25 = arith.constant 0.000000e+00 : f32
    %30 = vector.broadcast %cst_25 : f32 to vector<8x256xf32>
    %31 = arith.cmpf ogt, %29, %30 : vector<8x256xf32>
    %cst_26 = arith.constant 1.000000e-01 : f32
    %32 = vector.broadcast %cst_26 : f32 to vector<8x256xf32>
    %33 = arith.mulf %32, %29 : vector<8x256xf32>
    %34 = arith.select %31, %29, %33 : vector<8x256xi1>, vector<8x256xf32>
    %c0_27 = arith.constant 0 : index
    %c0_28 = arith.constant 0 : index
    %c0_29 = arith.constant 0 : index
    %35 = vector.load %arg4[%c0_27, %c0_28, %c0_29] : memref<1x8x256xf32, #tpu.memory_space<vmem>>, vector<1x8x256xf32>
    %36 = vector.shape_cast %35 : vector<1x8x256xf32> to vector<8x256xf32>
    %37 = vector.shape_cast %34 : vector<8x256xf32> to vector<1x8x256xf32>
    tpu.vector_store %arg4[%c0_27, %c0_28, %c0_29], %37 {strides = array<i32>} : memref<1x8x256xf32, #tpu.memory_space<vmem>>, vector<1x8x256xf32>,
    return
  }
  func.func @transform_0(%arg0: i32) -> (i32, i32, i32, i32) {
    %c0_i32 = arith.constant 0 : i32
    %c0_i32_0 = arith.constant 0 : i32
    %c0_i32_1 = arith.constant 0 : i32
    %c0_i32_2 = arith.constant 0 : i32
    return %arg0, %c0_i32, %c0_i32_0, %c0_i32_1 : i32, i32, i32, i32
  }
  func.func @transform_1(%arg0: i32) -> (i32, i32) {
    %c0_i32 = arith.constant 0 : i32
    %c0_i32_0 = arith.constant 0 : i32
    %c0_i32_1 = arith.constant 0 : i32
    return %c0_i32, %c0_i32_0 : i32, i32
  }
  func.func @transform_2(%arg0: i32) -> (i32, i32) {
    %c0_i32 = arith.constant 0 : i32
    %c0_i32_0 = arith.constant 0 : i32
    %c0_i32_1 = arith.constant 0 : i32
    return %c0_i32, %c0_i32_0 : i32, i32
  }
  func.func @transform_3(%arg0: i32) -> (i32, i32, i32) {
    %c0_i32 = arith.constant 0 : i32
    %c0_i32_0 = arith.constant 0 : i32
    %c0_i32_1 = arith.constant 0 : i32
    return %arg0, %c0_i32, %c0_i32_0 : i32, i32, i32
  }
}

</mosaic_0001>

<bundles_post_ra>
// kernel: conv_block_forward.1
= control target key start
LH: loop header
LB: loop body
LE: loop exit
PB: predicated region body
PF: predicated region fallthrough
CT: control target
= control target key end

     0   :  { %s539_s12 = smov 0   ;;  %s578_s0 = inlined_call_operand.vmem [shape: bf16[2,3,16,288], index: 0, kind: input, shape index: {}]   ;;  %s579_s1 = inlined_call_operand.vmem [shape: bf16[8,144], index: 1, kind: input, shape index: {}]   ;;  %s580_s2 = inlined_call_operand.vmem [shape: f32[8,1], index: 2, kind: input, shape index: {}]   ;;  %s581_s3 = inlined_call_operand.vmem [shape: f32[2,8,256], index: 3, kind: output, shape index: {}]  }
   0x1 LB: > { %s450_s13 = sadd.s32 4294967295, %s514_s12   ;;  %p454_p0 = scmp.ge.s32.totalorder %s514_s12, 1  ;;  %s514_s12 = sphi %s539_s12, %s13_s12  }
   0x2   : > { %p137_p1 = scmp.lt.s32.totalorder %s514_s12, 3 }
   0x4   : > { %p138_p2 = pnand %p454_p0, %p137_p1 }
   0x5   : > { %p161_p3 = scmp.lt.s32.totalorder (!%p138_p2), %s450_s13, 1  ;;  %s516_s18 = smov (!%p138_p2), 112   ;;  %v311_v9 = vld [vmem:[%s579_s1] sm:$0xff] (!%p138_p2)  ;;  %vm342_vm0 = vcmask (!%p138_p2), 130048   ;;  %v518_v11 = vmov (!%p138_p2), 0   ;;  %vm199_vm1 = vcmask (!%p138_p2), 916480  }
   0x6   : > { %141 = sbr.rel (%p138_p2) target bundleno = 389 (0x185), region = 32  ;;  %s517_s19 = smov (!%p138_p2), 96   ;;  %v476_v10 = vcombine.high (!%p138_p2), %v311_v9, %v311_v9  ;;  %493 = vset.pattern.permute.xlu0 (!%p138_p2), %v518_v11  ;;  %v330_v12 = vld [vmem:[%s580_s2] sm:$0xff] (!%p138_p2)  ;;  %vm212_vm2 = vcmask (!%p138_p2), 785408   ;;  %v475_v43 = vcombine.low (!%p138_p2), %v311_v9, %v311_v9 }
   0x8   : > { %477 = vmatprep.mubr.msk.bf16.mxu0 (!%p138_p2), %vm342_vm0, %v476_v10 }
   0xd   : > { %s583_s13 = smov (!%p161_p3, %s450_s13), 1 }
   0xe   : > { %s481_s14 = smul.u32 72, %s583_s13  ;;  %s480_s24 = sshll.u32 %s583_s13, 4 }
   0xf   : > { %s170_s27 = scalar_lea.vmem %s581_s3, %s480_s24 }
  0x10   : > { %s165_s17 = scalar_lea.vmem %s578_s0, %s481_s14 }
  0x11   : > { %v494_v0 = vld [vmem:[%s165_s17 + $0x4] ss:$12 sps:$4 sm:$0xff]   ;;  %v496_v1 = vld [vmem:[%s165_s17] ss:$12 sps:$4 sm:$0xff]   ;;  %v497_v2 = vld [vmem:[%s165_s17 + $0x8] ss:$12 sps:$4 sm:$0xff]  }
  0x12   : > { %195 = vrot.lane.b32.xlu0 %v494_v0, %s516_s18  ;;  %346 = vmatprep.subr.bf16.mxu0 %v494_v0  ;;  %v498_v3 = vld [vmem:[%s165_s17 + $0x1c] ss:$12 sps:$4 sm:$0xff]   ;;  %v501_v4 = vld [vmem:[%s165_s17 + $0x18] ss:$12 sps:$4 sm:$0xff]   ;;  %v500_v5 = vld [vmem:[%s165_s17 + $0x20] ss:$12 sps:$4 sm:$0xff]  }
  0x13   : > { %193 = vrot.lane.b32.xlu1 %v496_v1, %s516_s18  ;;  %347 = vmatpush1.bf16.msra.mxu0 %v496_v1  ;;  %v502_v6 = vld [vmem:[%s165_s17 + $0x34] ss:$12 sps:$4 sm:$0xff]   ;;  %v505_v7 = vld [vmem:[%s165_s17 + $0x30] ss:$12 sps:$4 sm:$0xff]   ;;  %v504_v8 = vld [vmem:[%s165_s17 + $0x38] ss:$12 sps:$4 sm:$0xff]  }
  0x14   : > { %348 = vmatprep.subr.bf16.mxu0 %v498_v3 }
  0x16   : > { %197 = vrot.lane.b32.xlu0 %v497_v2, %s516_s18 }
  0x17   : > { %243 = vrot.lane.b32.xlu1 %v498_v3, %s516_s18  ;;  %349 = vmatpush1.bf16.msra.mxu0 %v501_v4 }
  0x18   : > { %350 = vmatprep.subr.bf16.mxu0 %v502_v6 }
  0x1a   : > { %245 = vrot.lane.b32.xlu0 %v500_v5, %s516_s18 }
  0x1b   : > { %241 = vrot.lane.b32.xlu1 %v501_v4, %s516_s18  ;;  %351 = vmatpush1.bf16.msra.mxu0 %v505_v7 }
  0x1e   : > { %289 = vrot.lane.b32.xlu0 %v502_v6, %s516_s18 }
  0x1f   : > { %291 = vrot.lane.b32.xlu1 %v504_v8, %s516_s18 }
  0x22   : > { %287 = vrot.lane.b32.xlu0 %v505_v7, %s516_s18 }
  0x23   : > { %208 = vrot.lane.b32.xlu1 %v494_v0, %s517_s19 }
  0x26   : > { %210 = vrot.lane.b32.xlu0 %v497_v2, %s517_s19 }
  0x27   : > { %206 = vrot.lane.b32.xlu1 %v496_v1, %s517_s19 }
  0x2a   : > { %255 = vrot.lane.b32.xlu0 %v498_v3, %s517_s19 }
  0x2b   : > { %257 = vrot.lane.b32.xlu1 %v500_v5, %s517_s19 }
  0x2e   : > { %253 = vrot.lane.b32.xlu0 %v501_v4, %s517_s19 }
  0x2f   : > { %301 = vrot.lane.b32.xlu1 %v502_v6, %s517_s19 }
  0x32   : > { %303 = vrot.lane.b32.xlu0 %v504_v8, %s517_s19 }
  0x33   : > { %299 = vrot.lane.b32.xlu1 %v505_v7, %s517_s19 }
  0x36   : > { %333 = vperm.xlu0 %493, %v330_v12  }
  0x84   : > { %v196_v13 = vpop.permute.xlu0 %195 }
  0x85   : > { %v194_v14 = vpop.permute.xlu1 %193 }
  0x86   : > { %v200_v18 = vsel %vm199_vm1, %v194_v14, %v196_v13 }
  0x88   : > { %v198_v15 = vpop.permute.xlu0 %197 }
  0x89   : > { %v244_v16 = vpop.permute.xlu1 %243  ;;  %v201_v17 = vsel %vm199_vm1, %v196_v13, %v198_v15 }
  0x8a   : > { %352 = vmatprep.subr.bf16.mxu0 %v201_v17 }
  0x8b   : > { %353 = vmatpush1.bf16.msra.mxu0 %v200_v18 }
  0x8c   : > { %v246_v19 = vpop.permute.xlu0 %245 }
  0x8d   : > { %v242_v20 = vpop.permute.xlu1 %241  ;;  %v248_v21 = vsel %vm199_vm1, %v244_v16, %v246_v19 }
  0x8e   : > { %354 = vmatprep.subr.bf16.mxu0 %v248_v21  ;;  %v247_v22 = vsel %vm199_vm1, %v242_v20, %v244_v16 }
  0x8f   : > { %355 = vmatpush1.bf16.msra.mxu0 %v247_v22 }
  0x90   : > { %v290_v23 = vpop.permute.xlu0 %289 }
  0x91   : > { %v292_v24 = vpop.permute.xlu1 %291 }
  0x92   : > { %v294_v25 = vsel %vm199_vm1, %v290_v23, %v292_v24 }
  0x93   : > { %356 = vmatprep.subr.bf16.mxu0 %v294_v25 }
  0x94   : > { %v288_v26 = vpop.permute.xlu0 %287 }
  0x95   : > { %v209_v27 = vpop.permute.xlu1 %208  ;;  %v293_v28 = vsel %vm199_vm1, %v288_v26, %v290_v23 }
  0x96   : > { %357 = vmatpush1.bf16.msra.mxu0 %v293_v28 }
  0x98   : > { %v211_v29 = vpop.permute.xlu0 %210 }
  0x99   : > { %v207_v30 = vpop.permute.xlu1 %206  ;;  %v214_v31 = vsel %vm212_vm2, %v209_v27, %v211_v29 }
  0x9a   : > { %358 = vmatprep.subr.bf16.mxu0 %v214_v31  ;;  %v213_v32 = vsel %vm212_vm2, %v207_v30, %v209_v27 }
  0x9b   : > { %359 = vmatpush1.bf16.msra.mxu0 %v213_v32 }
  0x9c   : > { %v256_v33 = vpop.permute.xlu0 %255 }
  0x9d   : > { %v258_v34 = vpop.permute.xlu1 %257 }
  0x9e   : > { %v260_v35 = vsel %vm212_vm2, %v256_v33, %v258_v34 }
  0x9f   : > { %360 = vmatprep.subr.bf16.mxu0 %v260_v35 }
  0xa0   : > { %v254_v36 = vpop.permute.xlu0 %253 }
  0xa1   : > { %v302_v37 = vpop.permute.xlu1 %301  ;;  %v259_v38 = vsel %vm212_vm2, %v254_v36, %v256_v33 }
  0xa2   : > { %361 = vmatpush1.bf16.msra.mxu0 %v259_v38 }
  0xa4   : > { %v304_v39 = vpop.permute.xlu0 %303 }
  0xa5   : > { %v300_v40 = vpop.permute.xlu1 %299  ;;  %v306_v41 = vsel %vm212_vm2, %v302_v37, %v304_v39 }
  0xa6   : > { %362 = vmatprep.subr.bf16.mxu0 %v306_v41  ;;  %v305_v42 = vsel %vm212_vm2, %v300_v40, %v302_v37 }
  0xa7   : > { %363 = vmatpush1.bf16.msra.mxu0 %v305_v42 }
  0xaa   : > { %379 = vmatmul.mubr.bf16.vlgmr.msra.gmra.mrb[0].mxu0 %v475_v43 }
  0xb5   : > { %v334_v44 = vpop.permute.xlu0 %333 }
 0x17d   : > { %v380_v45 = vpop.f32.mrb[0].mxu0 }
 0x17e   : > { %v381_v46 = vadd.f32 %v380_v45, %v334_v44  ;;  %v382_v47 = vpop.f32.mrb[1].mxu0 }
 0x17f   : > { %v383_v48 = vadd.f32 %v382_v47, %v334_v44  ;;  %v384_v49 = vpop.f32.mrb[2].mxu0 }
 0x180   : > { %vm387_vm3 = vcmp.gt.f32.partialorder %v381_v46, 0.0  ;;  %v389_v50 = vmul.f32 0.1, %v381_v46  ;;  %v385_v51 = vpop.f32.mrb[3].mxu0 }
 0x181   : > { %vm388_vm4 = vcmp.gt.f32.partialorder %v383_v48, 0.0  ;;  %v390_v52 = vmul.f32 0.1, %v383_v48 }
 0x182   : > { %v391_v53 = vsel %vm387_vm3, %v381_v46, %v389_v50 }
 0x183   : > { %393 = vst [vmem:[%s170_s27] sm:$0xff] %v391_v53  ;;  %v392_v54 = vsel %vm388_vm4, %v383_v48, %v390_v52 }
 0x184   : > { %394 = vst [vmem:[%s170_s27 + $0x8] sm:$0xff] %v392_v54 }
 0x185 PF: > { %s13_s12 = sadd.s32 1, %s514_s12  }
 0x186   : > { %p10_p4 = scmp.ge.s32.totalorder %s13_s12, 4  }
 0x188   :  { %12 = sbr.rel (!%p10_p4) target bundleno = 1 (0x1), region = 64 }

</bundles_post_ra>
